<compile_context>
chip_gen: v5e
topology: v5e:2x2
jax: 0.10.0
libtpu: 0.0.40
codegen_flags: <defaults>
</compile_context>

<pallas_src>
import jax
import jax.numpy as jnp
import numpy as np
from jax.experimental import pallas as pl
from jax.experimental.pallas import tpu as pltpu

C_OUT = 30                    # out channels of both convs
C_PAD = 32                    # padded channel count (multiple of sublane 8)
K1 = 25                       # conv1 kernel width (1, 25)
PK = 75                       # avg-pool kernel width (1, 75)
PS = 15                       # avg-pool stride
TEFF = K1 + PK - 1            # effective fused kernel width = 99
A = (TEFF + PS - 1) // PS     # polyphase taps = 7


def fe_kernel(x_ref, k2_ref, beff_ref, o_ref):
    # x_ref   : (TN, M15, H*PS)   regrouped input, [n, m, h*PS+b] = x[n, h, PS*m+b]
    # k2_ref  : (A, H*PS, C_PAD)  fused conv1+conv2+avgpool weights per phase
    # beff_ref: (1, C_PAD)        fused bias
    # o_ref   : (TN*Wout, C_PAD)  row = n_local*Wout + j
    tn, m15, hp = x_ref.shape
    a_taps = k2_ref.shape[0]
    wout = m15 - a_taps + 1
    c_pad = o_ref.shape[-1]

    x = x_ref[...]                                        # (TN, M15, HP)
    acc = jnp.zeros((tn * wout, c_pad), dtype=jnp.float32)
    for a in range(a_taps):                               # 7 MXU matmuls
        slab = x[:, a:a + wout, :].reshape(tn * wout, hp) # leading-dim collapse only
        acc = acc + jnp.dot(slab, k2_ref[a],
                            preferred_element_type=jnp.float32)
    o_ref[...] = acc + beff_ref[...]


def fe_forward(x, w1, b1, w2, b2, *, tile_n=8):
    """x: (N, 1, H, W) float32; weights in PyTorch conv layouts.

    Returns (N, 30*Wout), matching FE(channel_size=H).forward.
    """
    N, Cin, H, W = x.shape
    assert Cin == 1
    assert tile_n % 8 == 0
    W1 = W - K1 + 1
    assert W1 >= PK, "time axis too short: need W >= K1 + PK - 1"
    Wout = (W1 - PK) // PS + 1

    # ---- fold conv1 -> conv2 -> avgpool into one strided conv (wrapper side) ----
    w1f = w1.reshape(C_OUT, K1).astype(jnp.float32)            # (30, 25)
    w2f = w2[:, :, :, 0].astype(jnp.float32)                   # (30, 30, H)
    weff = jnp.einsum('och,ck->ohk', w2f, w1f)                 # (30, H, 25)
    k_idx = jnp.arange(K1)[:, None]
    t_idx = jnp.arange(TEFF)[None, :]
    ind = ((t_idx - k_idx) >= 0) & ((t_idx - k_idx) < PK)      # (25, 99)
    keff = jnp.einsum('ohk,kt->oht', weff,
                      ind.astype(jnp.float32)) / PK            # (30, H, 99)
    beff = jnp.einsum('och,c->o', w2f, b1.astype(jnp.float32)) \
        + b2.astype(jnp.float32)                               # (30,)

    # polyphase split t = PS*a + b, pad channels to 32
    keff_p = jnp.pad(keff, ((0, C_PAD - C_OUT), (0, 0), (0, A * PS - TEFF)))
    k2 = keff_p.reshape(C_PAD, H, A, PS).transpose(2, 1, 3, 0) \
               .reshape(A, H * PS, C_PAD)                      # (A, H*PS, 32)
    beff_p = jnp.pad(beff, (0, C_PAD - C_OUT)).reshape(1, C_PAD)

    # ---- regroup x: (N,1,H,W) -> (N, M15, H*PS), [n, m, h*PS+b] = x[n,h,PS*m+b] ----
    M15 = Wout + A - 1
    W_need = M15 * PS          # non-zero weights only touch indices < 15*Wout+84
    x2 = x[:, 0, :, :].astype(jnp.float32)
    if W >= W_need:
        x2 = x2[:, :, :W_need]
    else:
        x2 = jnp.pad(x2, ((0, 0), (0, 0), (0, W_need - W)))
    xr = x2.reshape(N, H, M15, PS).transpose(0, 2, 1, 3).reshape(N, M15, H * PS)

    n_pad = pl.cdiv(N, tile_n) * tile_n
    if n_pad != N:
        xr = jnp.pad(xr, ((0, n_pad - N), (0, 0), (0, 0)))
    nb = n_pad // tile_n

    out = pl.pallas_call(
        fe_kernel,
        out_shape=jax.ShapeDtypeStruct((n_pad * Wout, C_PAD), jnp.float32),
        grid=(nb,),
        in_specs=[
            pl.BlockSpec((tile_n, M15, H * PS), lambda n: (n, 0, 0)),
            pl.BlockSpec((A, H * PS, C_PAD), lambda n: (0, 0, 0)),
            pl.BlockSpec((1, C_PAD), lambda n: (0, 0)),
        ],
        out_specs=pl.BlockSpec((tile_n * Wout, C_PAD), lambda n: (n, 0)),
        compiler_params=pltpu.CompilerParams(
            dimension_semantics=("parallel",)),
    )(xr, k2, beff_p)

    out = out.reshape(n_pad, Wout, C_PAD)[:N, :, :C_OUT]       # (N, Wout, 30)
    return out.transpose(0, 2, 1).reshape(N, C_OUT * Wout)     # nn.Flatten order


def fe_reference(x, w1, b1, w2, b2):
    """Pure-JAX reference of the PyTorch forward (for verification)."""
    N, _, H, W = x.shape
    W1 = W - K1 + 1
    Wout = (W1 - PK) // PS + 1
    patches = jnp.stack([x[:, 0, :, k:k + W1] for k in range(K1)], axis=-1)
    y1 = jnp.einsum('nhwk,ck->nchw', patches, w1.reshape(C_OUT, K1))
    y1 = y1 + b1[None, :, None, None]
    y2 = jnp.einsum('nchw,och->now', y1, w2[..., 0]) + b2[None, :, None]
    pooled = jnp.stack(
        [y2[:, :, j * PS:j * PS + PK].mean(-1) for j in range(Wout)], axis=-1)
    return pooled.reshape(N, -1)


if __name__ == "__main__":
    channel_size = 8                    # FE(channel_size=8) for a small test
    N, H, W = 16, channel_size, 128     # x: (N, 1, channel_size, time)

    key = jax.random.PRNGKey(0)
    kx, k1, k2, k3, k4 = jax.random.split(key, 5)
    x = jax.random.normal(kx, (N, 1, H, W), dtype=jnp.float32)
    w1 = 0.1 * jax.random.normal(k1, (C_OUT, 1, 1, K1), dtype=jnp.float32)
    b1 = 0.1 * jax.random.normal(k2, (C_OUT,), dtype=jnp.float32)
    w2 = 0.1 * jax.random.normal(k3, (C_OUT, C_OUT, H, 1), dtype=jnp.float32)
    b2 = 0.1 * jax.random.normal(k4, (C_OUT,), dtype=jnp.float32)

    fe = jax.jit(fe_forward)
    out = jax.block_until_ready(fe(x, w1, b1, w2, b2))

    ref = fe_reference(x, w1, b1, w2, b2)
    np.testing.assert_allclose(np.asarray(out), np.asarray(ref),
                               rtol=1e-4, atol=1e-4)
    print("KERNEL_OK")
</pallas_src>

<mosaic_0001>
module attributes {stable_mosaic.version = 11 : i64} {
  func.func @fe_kernel(%arg0: i32, %arg1: memref<8x8x120xf32, #tpu.memory_space<vmem>>, %arg2: memref<7x120x32xf32, #tpu.memory_space<vmem>>, %arg3: memref<1x32xf32, #tpu.memory_space<vmem>>, %arg4: memref<16x32xf32, #tpu.memory_space<vmem>>) attributes {dimension_semantics = [#tpu.dimension_semantics<parallel>], iteration_bounds = array<i64: 2>, scalar_prefetch = 0 : i64, scratch_operands = 0 : i64, tpu.core_type = #tpu.core_type<tc>, window_params = [{transform_indices = @transform_0, window_bounds = array<i64: 8, 8, 120>}, {pipeline_mode = #tpu.pipeline_mode<synchronous>, transform_indices = @transform_1, window_bounds = array<i64: 7, 120, 32>}, {pipeline_mode = #tpu.pipeline_mode<synchronous>, transform_indices = @transform_2, window_bounds = array<i64: 1, 32>}, {transform_indices = @transform_3, window_bounds = array<i64: 16, 32>}]} {
    %c0 = arith.constant 0 : index
    %c0_0 = arith.constant 0 : index
    %c0_1 = arith.constant 0 : index
    %0 = vector.load %arg1[%c0, %c0_0, %c0_1] : memref<8x8x120xf32, #tpu.memory_space<vmem>>, vector<8x8x120xf32>
    %cst = arith.constant 0.000000e+00 : f32
    %1 = vector.broadcast %cst : f32 to vector<16x32xf32>
    %2 = vector.extract_strided_slice %0 {offsets = [0, 0, 0], sizes = [8, 2, 120], strides = [1, 1, 1]} : vector<8x8x120xf32> to vector<8x2x120xf32>
    %3 = vector.shape_cast %2 : vector<8x2x120xf32> to vector<16x120xf32>
    %c0_2 = arith.constant 0 : index
    %c0_3 = arith.constant 0 : index
    %c0_4 = arith.constant 0 : index
    %4 = vector.load %arg2[%c0_2, %c0_3, %c0_4] : memref<7x120x32xf32, #tpu.memory_space<vmem>>, vector<1x120x32xf32>
    %5 = vector.shape_cast %4 : vector<1x120x32xf32> to vector<120x32xf32>
    %cst_5 = arith.constant dense<0.000000e+00> : vector<16x32xf32>
    %6 = tpu.matmul %3, %5, %cst_5 {dimension_numbers = #tpu.dot_dimension_numbers<[1], [0], [0], [1], [0, 0, 1, 1], [], []>} : vector<16x120xf32>, vector<120x32xf32>, vector<16x32xf32> -> vector<16x32xf32>
    %7 = arith.addf %1, %6 : vector<16x32xf32>
    %8 = vector.extract_strided_slice %0 {offsets = [0, 1, 0], sizes = [8, 2, 120], strides = [1, 1, 1]} : vector<8x8x120xf32> to vector<8x2x120xf32>
    %9 = vector.shape_cast %8 : vector<8x2x120xf32> to vector<16x120xf32>
    %c1 = arith.constant 1 : index
    %c0_6 = arith.constant 0 : index
    %c0_7 = arith.constant 0 : index
    %10 = vector.load %arg2[%c1, %c0_6, %c0_7] : memref<7x120x32xf32, #tpu.memory_space<vmem>>, vector<1x120x32xf32>
    %11 = vector.shape_cast %10 : vector<1x120x32xf32> to vector<120x32xf32>
    %cst_8 = arith.constant dense<0.000000e+00> : vector<16x32xf32>
    %12 = tpu.matmul %9, %11, %cst_8 {dimension_numbers = #tpu.dot_dimension_numbers<[1], [0], [0], [1], [0, 0, 1, 1], [], []>} : vector<16x120xf32>, vector<120x32xf32>, vector<16x32xf32> -> vector<16x32xf32>
    %13 = arith.addf %7, %12 : vector<16x32xf32>
    %14 = vector.extract_strided_slice %0 {offsets = [0, 2, 0], sizes = [8, 2, 120], strides = [1, 1, 1]} : vector<8x8x120xf32> to vector<8x2x120xf32>
    %15 = vector.shape_cast %14 : vector<8x2x120xf32> to vector<16x120xf32>
    %c2 = arith.constant 2 : index
    %c0_9 = arith.constant 0 : index
    %c0_10 = arith.constant 0 : index
    %16 = vector.load %arg2[%c2, %c0_9, %c0_10] : memref<7x120x32xf32, #tpu.memory_space<vmem>>, vector<1x120x32xf32>
    %17 = vector.shape_cast %16 : vector<1x120x32xf32> to vector<120x32xf32>
    %cst_11 = arith.constant dense<0.000000e+00> : vector<16x32xf32>
    %18 = tpu.matmul %15, %17, %cst_11 {dimension_numbers = #tpu.dot_dimension_numbers<[1], [0], [0], [1], [0, 0, 1, 1], [], []>} : vector<16x120xf32>, vector<120x32xf32>, vector<16x32xf32> -> vector<16x32xf32>
    %19 = arith.addf %13, %18 : vector<16x32xf32>
    %20 = vector.extract_strided_slice %0 {offsets = [0, 3, 0], sizes = [8, 2, 120], strides = [1, 1, 1]} : vector<8x8x120xf32> to vector<8x2x120xf32>
    %21 = vector.shape_cast %20 : vector<8x2x120xf32> to vector<16x120xf32>
    %c3 = arith.constant 3 : index
    %c0_12 = arith.constant 0 : index
    %c0_13 = arith.constant 0 : index
    %22 = vector.load %arg2[%c3, %c0_12, %c0_13] : memref<7x120x32xf32, #tpu.memory_space<vmem>>, vector<1x120x32xf32>
    %23 = vector.shape_cast %22 : vector<1x120x32xf32> to vector<120x32xf32>
    %cst_14 = arith.constant dense<0.000000e+00> : vector<16x32xf32>
    %24 = tpu.matmul %21, %23, %cst_14 {dimension_numbers = #tpu.dot_dimension_numbers<[1], [0], [0], [1], [0, 0, 1, 1], [], []>} : vector<16x120xf32>, vector<120x32xf32>, vector<16x32xf32> -> vector<16x32xf32>
    %25 = arith.addf %19, %24 : vector<16x32xf32>
    %26 = vector.extract_strided_slice %0 {offsets = [0, 4, 0], sizes = [8, 2, 120], strides = [1, 1, 1]} : vector<8x8x120xf32> to vector<8x2x120xf32>
    %27 = vector.shape_cast %26 : vector<8x2x120xf32> to vector<16x120xf32>
    %c4 = arith.constant 4 : index
    %c0_15 = arith.constant 0 : index
    %c0_16 = arith.constant 0 : index
    %28 = vector.load %arg2[%c4, %c0_15, %c0_16] : memref<7x120x32xf32, #tpu.memory_space<vmem>>, vector<1x120x32xf32>
    %29 = vector.shape_cast %28 : vector<1x120x32xf32> to vector<120x32xf32>
    %cst_17 = arith.constant dense<0.000000e+00> : vector<16x32xf32>
    %30 = tpu.matmul %27, %29, %cst_17 {dimension_numbers = #tpu.dot_dimension_numbers<[1], [0], [0], [1], [0, 0, 1, 1], [], []>} : vector<16x120xf32>, vector<120x32xf32>, vector<16x32xf32> -> vector<16x32xf32>
    %31 = arith.addf %25, %30 : vector<16x32xf32>
    %32 = vector.extract_strided_slice %0 {offsets = [0, 5, 0], sizes = [8, 2, 120], strides = [1, 1, 1]} : vector<8x8x120xf32> to vector<8x2x120xf32>
    %33 = vector.shape_cast %32 : vector<8x2x120xf32> to vector<16x120xf32>
    %c5 = arith.constant 5 : index
    %c0_18 = arith.constant 0 : index
    %c0_19 = arith.constant 0 : index
    %34 = vector.load %arg2[%c5, %c0_18, %c0_19] : memref<7x120x32xf32, #tpu.memory_space<vmem>>, vector<1x120x32xf32>
    %35 = vector.shape_cast %34 : vector<1x120x32xf32> to vector<120x32xf32>
    %cst_20 = arith.constant dense<0.000000e+00> : vector<16x32xf32>
    %36 = tpu.matmul %33, %35, %cst_20 {dimension_numbers = #tpu.dot_dimension_numbers<[1], [0], [0], [1], [0, 0, 1, 1], [], []>} : vector<16x120xf32>, vector<120x32xf32>, vector<16x32xf32> -> vector<16x32xf32>
    %37 = arith.addf %31, %36 : vector<16x32xf32>
    %38 = vector.extract_strided_slice %0 {offsets = [0, 6, 0], sizes = [8, 2, 120], strides = [1, 1, 1]} : vector<8x8x120xf32> to vector<8x2x120xf32>
    %39 = vector.shape_cast %38 : vector<8x2x120xf32> to vector<16x120xf32>
    %c6 = arith.constant 6 : index
    %c0_21 = arith.constant 0 : index
    %c0_22 = arith.constant 0 : index
    %40 = vector.load %arg2[%c6, %c0_21, %c0_22] : memref<7x120x32xf32, #tpu.memory_space<vmem>>, vector<1x120x32xf32>
    %41 = vector.shape_cast %40 : vector<1x120x32xf32> to vector<120x32xf32>
    %cst_23 = arith.constant dense<0.000000e+00> : vector<16x32xf32>
    %42 = tpu.matmul %39, %41, %cst_23 {dimension_numbers = #tpu.dot_dimension_numbers<[1], [0], [0], [1], [0, 0, 1, 1], [], []>} : vector<16x120xf32>, vector<120x32xf32>, vector<16x32xf32> -> vector<16x32xf32>
    %43 = arith.addf %37, %42 : vector<16x32xf32>
    %c0_24 = arith.constant 0 : index
    %c0_25 = arith.constant 0 : index
    %44 = vector.load %arg3[%c0_24, %c0_25] : memref<1x32xf32, #tpu.memory_space<vmem>>, vector<1x32xf32>
    %45 = vector.broadcast %44 : vector<1x32xf32> to vector<16x32xf32>
    %46 = arith.addf %43, %45 : vector<16x32xf32>
    %c0_26 = arith.constant 0 : index
    %c0_27 = arith.constant 0 : index
    %47 = vector.load %arg4[%c0_26, %c0_27] : memref<16x32xf32, #tpu.memory_space<vmem>>, vector<16x32xf32>
    tpu.vector_store %arg4[%c0_26, %c0_27], %46 {strides = array<i32>} : memref<16x32xf32, #tpu.memory_space<vmem>>, vector<16x32xf32>,
    return
  }
  func.func @transform_0(%arg0: i32) -> (i32, i32, i32) {
    %c0_i32 = arith.constant 0 : i32
    %c0_i32_0 = arith.constant 0 : i32
    %c0_i32_1 = arith.constant 0 : i32
    return %arg0, %c0_i32, %c0_i32_0 : i32, i32, i32
  }
  func.func @transform_1(%arg0: i32) -> (i32, i32, i32) {
    %c0_i32 = arith.constant 0 : i32
    %c0_i32_0 = arith.constant 0 : i32
    %c0_i32_1 = arith.constant 0 : i32
    %c0_i32_2 = arith.constant 0 : i32
    return %c0_i32, %c0_i32_0, %c0_i32_1 : i32, i32, i32
  }
  func.func @transform_2(%arg0: i32) -> (i32, i32) {
    %c0_i32 = arith.constant 0 : i32
    %c0_i32_0 = arith.constant 0 : i32
    %c0_i32_1 = arith.constant 0 : i32
    return %c0_i32, %c0_i32_0 : i32, i32
  }
  func.func @transform_3(%arg0: i32) -> (i32, i32) {
    %c0_i32 = arith.constant 0 : i32
    %c0_i32_0 = arith.constant 0 : i32
    return %arg0, %c0_i32 : i32, i32
  }
}

</mosaic_0001>

<bundles_post_ra>
// kernel: fe_forward.1
= control target key start
LH: loop header
LB: loop body
LE: loop exit
PB: predicated region body
PF: predicated region fallthrough
CT: control target
= control target key end

     0   :  { %s1105_s12 = smov 0   ;;  %s1585_s0 = inlined_call_operand.vmem [shape: f32[16,8,120], index: 0, kind: input, shape index: {}]   ;;  %s1586_s1 = inlined_call_operand.vmem [shape: f32[7,120,32], index: 1, kind: input, shape index: {}]   ;;  %s1587_s2 = inlined_call_operand.vmem [shape: f32[1,32], index: 2, kind: input, shape index: {}]   ;;  %s1588_s3 = inlined_call_operand.vmem [shape: f32[32,32], index: 3, kind: output, shape index: {}]  }
   0x1 LB: > { %s906_s13 = sadd.s32 4294967295, %s1083_s12   ;;  %p910_p0 = scmp.ge.s32.totalorder %s1083_s12, 1  ;;  %s1083_s12 = sphi %s1105_s12, %s13_s12  }
   0x2   : > { %p138_p1 = scmp.lt.s32.totalorder %s1083_s12, 3 }
   0x4   : > { %p139_p2 = pnand %p910_p0, %p138_p1 }
   0x5   : > { %s1178_s4 = sshll.u32 (!%p139_p2), %s906_s13, 3  ;;  %s913_s30 = sshll.u32 (!%p139_p2), %s906_s13, 1 }
   0x6   : > { %142 = sbr.rel (%p139_p2) target bundleno = 405 (0x195), region = 32  ;;  %p163_p3 = scmp.lt.s32.totalorder (!%p139_p2), %s1178_s4, 15 }
   0x7   : > { %p169_p4 = scmp.lt.s32.totalorder (!%p139_p2), %s913_s30, 3 }
   0xb   : > { %v945_v0 = vld [vmem:[%s1586_s1 + $0xe8] sm:$0xff]  ;;  %v944_v1 = vld [vmem:[%s1586_s1 + $0xe0] sm:$0xff]  ;;  %v196_v2 = vld [vmem:[%s1586_s1 + $0x70] sm:$0xff]  ;;  %s1592_s4 = smov (!%p163_p3, %s1178_s4), 15  ;;  %vm285_vm0 = vcmask 982016   ;;  %vm213_vm1 = vcmask 1040384  }
   0xc   : > { %291 = vmatpush.msra.mxu0 %v945_v0  ;;  %335 = vmatpush.msra.mxu1 %v196_v2  ;;  %v989_v3 = vld [vmem:[%s1586_s1 + $0x1d8] sm:$0xff]  ;;  %v195_v4 = vld [vmem:[%s1586_s1 + $0x68] sm:$0xff]  ;;  %v988_v6 = vld [vmem:[%s1586_s1 + $0x1d0] sm:$0xff]  ;;  %s912_s27 = sshll.u32 %s1592_s4, 3  ;;  %vm214_vm2 = vcmask 1042434   ;;  %vm216_vm4 = vcmask 1044484  }
   0xd   : > { %535 = vmatpush.msra.mxu3 %v989_v3  ;;  %v943_v5 = vld [vmem:[%s1586_s1 + $0xd8] sm:$0xff]  ;;  %v194_v7 = vld [vmem:[%s1586_s1 + $0x60] sm:$0xff]  ;;  %v987_v9 = vld [vmem:[%s1586_s1 + $0x1c8] sm:$0xff]  ;;  %s1274_s17 = scalar_lea.vmem %s1585_s0, %s912_s27  ;;  %vm218_vm6 = vcmask 1046534   ;;  %s1594_s30 = smov (!%p169_p4, %s913_s30), 3  ;;  %vm847_vm8 = vcmask 261120  }
   0xe   : > { %292 = vmatpush.msra.mxu0 %v944_v1  ;;  %336 = vmatpush.msra.mxu1 %v195_v4  ;;  %v964_v8 = vld [vmem:[%s1586_s1 + $0x160] sm:$0xff]  ;;  %v942_v10 = vld [vmem:[%s1586_s1 + $0xd0] sm:$0xff]  ;;  %v193_v11 = vld [vmem:[%s1586_s1 + $0x58] sm:$0xff]  ;;  %s914_s5 = sshll.u32 %s1594_s30, 3 }
   0xf   : > { %536 = vmatpush.msra.mxu3 %v988_v6  ;;  %413 = vmatpush.msra.mxu2 %v964_v8  ;;  %v963_v12 = vld [vmem:[%s1586_s1 + $0x158] sm:$0xff]  ;;  %v986_v13 = vld [vmem:[%s1586_s1 + $0x1c0] sm:$0xff]  ;;  %v962_v14 = vld [vmem:[%s1586_s1 + $0x150] sm:$0xff]  ;;  %s172_s9 = scalar_lea.vmem %s1588_s3, %s914_s5 }
  0x10   : > { %293 = vmatpush.msra.mxu0 %v943_v5  ;;  %337 = vmatpush.msra.mxu1 %v194_v7  ;;  %v941_v15 = vld [vmem:[%s1586_s1 + $0xc8] sm:$0xff]  ;;  %v192_v16 = vld [vmem:[%s1586_s1 + $0x50] sm:$0xff]  ;;  %v985_v17 = vld [vmem:[%s1586_s1 + $0x1b8] sm:$0xff] }
  0x11   : > { %537 = vmatpush.msra.mxu3 %v987_v9  ;;  %414 = vmatpush.msra.mxu2 %v963_v12  ;;  %v961_v18 = vld [vmem:[%s1586_s1 + $0x148] sm:$0xff]  ;;  %v940_v19 = vld [vmem:[%s1586_s1 + $0xc0] sm:$0xff]  ;;  %v984_v21 = vld [vmem:[%s1586_s1 + $0x1b0] sm:$0xff] }
  0x12   : > { %294 = vmatpush.msra.mxu0 %v942_v10  ;;  %338 = vmatpush.msra.mxu1 %v193_v11  ;;  %v191_v20 = vld [vmem:[%s1586_s1 + $0x48] sm:$0xff]  ;;  %v960_v22 = vld [vmem:[%s1586_s1 + $0x140] sm:$0xff]  ;;  %v939_v23 = vld [vmem:[%s1586_s1 + $0xb8] sm:$0xff] }
  0x13   : > { %538 = vmatpush.msra.mxu3 %v986_v13  ;;  %415 = vmatpush.msra.mxu2 %v962_v14  ;;  %v190_v24 = vld [vmem:[%s1586_s1 + $0x40] sm:$0xff]  ;;  %v983_v25 = vld [vmem:[%s1586_s1 + $0x1a8] sm:$0xff]  ;;  %v959_v26 = vld [vmem:[%s1586_s1 + $0x138] sm:$0xff] }
  0x14   : > { %295 = vmatpush.msra.mxu0 %v941_v15  ;;  %339 = vmatpush.msra.mxu1 %v192_v16  ;;  %v938_v27 = vld [vmem:[%s1586_s1 + $0xb0] sm:$0xff]  ;;  %v189_v28 = vld [vmem:[%s1586_s1 + $0x38] sm:$0xff]  ;;  %v982_v29 = vld [vmem:[%s1586_s1 + $0x1a0] sm:$0xff] }
  0x15   : > { %539 = vmatpush.msra.mxu3 %v985_v17  ;;  %416 = vmatpush.msra.mxu2 %v961_v18  ;;  %v958_v30 = vld [vmem:[%s1586_s1 + $0x130] sm:$0xff]  ;;  %v937_v31 = vld [vmem:[%s1586_s1 + $0xa8] sm:$0xff]  ;;  %v981_v33 = vld [vmem:[%s1586_s1 + $0x198] sm:$0xff] }
  0x16   : > { %296 = vmatpush.msra.mxu0 %v940_v19  ;;  %340 = vmatpush.msra.mxu1 %v191_v20  ;;  %v188_v32 = vld [vmem:[%s1586_s1 + $0x30] sm:$0xff]  ;;  %v957_v34 = vld [vmem:[%s1586_s1 + $0x128] sm:$0xff]  ;;  %v936_v35 = vld [vmem:[%s1586_s1 + $0xa0] sm:$0xff] }
  0x17   : > { %540 = vmatpush.msra.mxu3 %v984_v21  ;;  %417 = vmatpush.msra.mxu2 %v960_v22  ;;  %v187_v36 = vld [vmem:[%s1586_s1 + $0x28] sm:$0xff]  ;;  %v980_v37 = vld [vmem:[%s1586_s1 + $0x190] sm:$0xff]  ;;  %v956_v38 = vld [vmem:[%s1586_s1 + $0x120] sm:$0xff] }
  0x18   : > { %297 = vmatpush.msra.mxu0 %v939_v23  ;;  %341 = vmatpush.msra.mxu1 %v190_v24  ;;  %v935_v39 = vld [vmem:[%s1586_s1 + $0x98] sm:$0xff]  ;;  %v186_v40 = vld [vmem:[%s1586_s1 + $0x20] sm:$0xff]  ;;  %v979_v41 = vld [vmem:[%s1586_s1 + $0x188] sm:$0xff] }
  0x19   : > { %541 = vmatpush.msra.mxu3 %v983_v25  ;;  %418 = vmatpush.msra.mxu2 %v959_v26  ;;  %v955_v42 = vld [vmem:[%s1586_s1 + $0x118] sm:$0xff]  ;;  %v934_v43 = vld [vmem:[%s1586_s1 + $0x90] sm:$0xff]  ;;  %v978_v45 = vld [vmem:[%s1586_s1 + $0x180] sm:$0xff] }
  0x1a   : > { %298 = vmatpush.msra.mxu0 %v938_v27  ;;  %342 = vmatpush.msra.mxu1 %v189_v28  ;;  %v185_v44 = vld [vmem:[%s1586_s1 + $0x18] sm:$0xff]  ;;  %v954_v46 = vld [vmem:[%s1586_s1 + $0x110] sm:$0xff]  ;;  %v933_v47 = vld [vmem:[%s1586_s1 + $0x88] sm:$0xff] }
  0x1b   : > { %542 = vmatpush.msra.mxu3 %v982_v29  ;;  %419 = vmatpush.msra.mxu2 %v958_v30  ;;  %v184_v48 = vld [vmem:[%s1586_s1 + $0x10] sm:$0xff]  ;;  %v932_v49 = vld [vmem:[%s1586_s1 + $0x80] sm:$0xff]  ;;  %v977_v50 = vld [vmem:[%s1586_s1 + $0x178] sm:$0xff] }
  0x1c   : > { %299 = vmatpush.msra.mxu0 %v937_v31  ;;  %343 = vmatpush.msra.mxu1 %v188_v32  ;;  %v953_v51 = vld [vmem:[%s1586_s1 + $0x108] sm:$0xff]  ;;  %v931_v52 = vld [vmem:[%s1586_s1 + $0x78] sm:$0xff]  ;;  %v976_v54 = vld [vmem:[%s1586_s1 + $0x170] sm:$0xff] }
  0x1d   : > { %543 = vmatpush.msra.mxu3 %v981_v33  ;;  %420 = vmatpush.msra.mxu2 %v957_v34  ;;  %v183_v53 = vld [vmem:[%s1586_s1 + $0x8] sm:$0xff]  ;;  %v1006_v55 = vld [vmem:[%s1586_s1 + $0x250] sm:$0xff]  ;;  %v182_v56 = vld [vmem:[%s1586_s1] sm:$0xff] }
  0x1e   : > { %300 = vmatpush.msra.mxu0 %v936_v35  ;;  %344 = vmatpush.msra.mxu1 %v187_v36  ;;  %v952_v57 = vld [vmem:[%s1586_s1 + $0x100] sm:$0xff]  ;;  %v1307_v59 = vld [vmem:[%s1274_s17 + $0x8] sm:$0xff]  ;;  %v1310_v60 = vld [vmem:[%s1274_s17 + $0x10] sm:$0xff] }
  0x1f   : > { %544 = vmatpush.msra.mxu3 %v980_v37  ;;  %421 = vmatpush.msra.mxu2 %v956_v38  ;;  %v1304_v58 = vld [vmem:[%s1274_s17] sm:$0xff]  ;;  %v1313_v61 = vld [vmem:[%s1274_s17 + $0x18] sm:$0xff]  ;;  %v975_v63 = vld [vmem:[%s1586_s1 + $0x168] sm:$0xff]  ;;  %v917_v2 = vrot.slane %v1307_v59, 9  ;;  %v919_v3 = vrot.slane %v1310_v60, 9 }
  0x20   : > { %301 = vmatpush.msra.mxu0 %v935_v39  ;;  %345 = vmatpush.msra.mxu1 %v186_v40  ;;  %v915_v62 = vrot.slane %v1304_v58, 9  ;;  %v1005_v0 = vld [vmem:[%s1586_s1 + $0x248] sm:$0xff]  ;;  %v921_v4 = vrot.slane %v1313_v61, 9  ;;  %v1332_v6 = vld [vmem:[%s1274_s17 + $0x38] sm:$0xff]  ;;  %v1335_v7 = vld [vmem:[%s1274_s17 + $0x20] sm:$0xff] }
  0x21   : > { %545 = vmatpush.msra.mxu3 %v979_v41  ;;  %422 = vmatpush.msra.mxu2 %v955_v42  ;;  %v1323_v1 = vld [vmem:[%s1274_s17 + $0x28] sm:$0xff]  ;;  %v951_v8 = vld [vmem:[%s1586_s1 + $0xf8] sm:$0xff]  ;;  %270 = vst [vmem:[#allocation1 + $0x1] ss:$4 sm:$0xff] %v917_v2  ;;  %v1341_v9 = vld [vmem:[%s1274_s17 + $0x30] sm:$0xff]  ;;  %v923_v10 = vrot.slane %v1335_v7, 9 }
  0x22   : > { %302 = vmatpush.msra.mxu0 %v934_v43  ;;  %346 = vmatpush.msra.mxu1 %v185_v44  ;;  %v1031_v5 = vld [vmem:[%s1586_s1 + $0x2c8] sm:$0xff]  ;;  %268 = vst [vmem:[#allocation1] ss:$4 sm:$0xff] %v915_v62  ;;  %v925_v11 = vrot.slane %v1323_v1, 9  ;;  %v1030_v12 = vld [vmem:[%s1586_s1 + $0x2c0] sm:$0xff]  ;;  %v927_v13 = vrot.slane %v1341_v9, 9  ;;  %vm215_vm3 = vmor %vm213_vm1, %vm214_vm2 }
  0x23   : > { %546 = vmatpush.msra.mxu3 %v978_v45  ;;  %423 = vmatpush.msra.mxu2 %v954_v46  ;;  %272 = vst [vmem:[#allocation1 + $0x2] ss:$4 sm:$0xff] %v919_v3  ;;  %v1004_v14 = vld [vmem:[%s1586_s1 + $0x240] sm:$0xff]  ;;  %v950_v15 = vld [vmem:[%s1586_s1 + $0xf0] sm:$0xff]  ;;  %v929_v16 = vrot.slane %v1332_v6, 9  ;;  %v1029_v17 = vld [vmem:[%s1586_s1 + $0x2b8] sm:$0xff] }
  0x24   : > { %303 = vmatpush.msra.mxu0 %v933_v47  ;;  %347 = vmatpush.msra.mxu1 %v184_v48  ;;  %274 = vst [vmem:[#allocation1 + $0x3] ss:$4 sm:$0xff] %v921_v4  ;;  %v1003_v18 = vld [vmem:[%s1586_s1 + $0x238] sm:$0xff]  ;;  %v1048_v19 = vld [vmem:[%s1586_s1 + $0x340] sm:$0xff]  ;;  %v1028_v20 = vld [vmem:[%s1586_s1 + $0x2b0] sm:$0xff] }
  0x25   : > { %547 = vmatpush.msra.mxu3 %v977_v50  ;;  %424 = vmatpush.msra.mxu2 %v953_v51  ;;  %276 = vst [vmem:[#allocation1 + $0x20] ss:$4 sm:$0xff] %v923_v10  ;;  %v1002_v21 = vld [vmem:[%s1586_s1 + $0x230] sm:$0xff]  ;;  %v1047_v22 = vld [vmem:[%s1586_s1 + $0x338] sm:$0xff]  ;;  %v1027_v23 = vld [vmem:[%s1586_s1 + $0x2a8] sm:$0xff] }
  0x26   : > { %304 = vmatpush.msra.mxu0 %v932_v49  ;;  %348 = vmatpush.msra.mxu1 %v183_v53  ;;  %278 = vst [vmem:[#allocation1 + $0x21] ss:$4 sm:$0xff] %v925_v11  ;;  %v1001_v24 = vld [vmem:[%s1586_s1 + $0x228] sm:$0xff]  ;;  %v1046_v25 = vld [vmem:[%s1586_s1 + $0x330] sm:$0xff]  ;;  %v1026_v26 = vld [vmem:[%s1586_s1 + $0x2a0] sm:$0xff] }
  0x27   : > { %548 = vmatpush.msra.mxu3 %v976_v54  ;;  %425 = vmatpush.msra.mxu2 %v952_v57  ;;  %280 = vst [vmem:[#allocation1 + $0x22] ss:$4 sm:$0xff] %v927_v13  ;;  %v1000_v28 = vld [vmem:[%s1586_s1 + $0x220] sm:$0xff]  ;;  %v1045_v29 = vld [vmem:[%s1586_s1 + $0x328] sm:$0xff]  ;;  %v999_v30 = vld [vmem:[%s1586_s1 + $0x218] sm:$0xff] }
  0x28   : > { %305 = vmatpush.msra.mxu0 %v931_v52  ;;  %349 = vmatpush.msra.mxu1 %v182_v56  ;;  %282 = vst [vmem:[#allocation1 + $0x23] ss:$4 sm:$0xff] %v929_v16  ;;  %v1025_v31 = vld [vmem:[%s1586_s1 + $0x298] sm:$0xff]  ;;  %v1044_v32 = vld [vmem:[%s1586_s1 + $0x320] sm:$0xff]  ;;  %vm217_vm5 = vmor %vm215_vm3, %vm216_vm4 }
  0x29   : > { %549 = vmatpush.msra.mxu3 %v975_v63  ;;  %426 = vmatpush.msra.mxu2 %v951_v8  ;;  %vm1428_vm7 = vmor %vm217_vm5, %vm218_vm6 }
  0x2a   : > { %615 = vmatpush.msrb.mxu0 %v1006_v55  ;;  %737 = vmatpush.msrb.mxu1 %v1031_v5 }
  0x2b   : > { %1053 = vmatpush.msrb.mxu3 %v1006_v55  ;;  %427 = vmatpush.msra.mxu2 %v950_v15  ;;  %v283_v27 = vld.sshfl [vmem:[#allocation1] sm:$0xff pattern:$0x73625140] }
  0x2c   : > { %616 = vmatpush.msrb.mxu0 %v1005_v0  ;;  %738 = vmatpush.msrb.mxu1 %v1030_v12  ;;  %313 = vst [vmem:[#allocation1] ss:$4 sm:$0xff] %v1304_v58 }
  0x2d   : > { %1054 = vmatpush.msrb.mxu3 %v1005_v0  ;;  %817 = vmatpush.msrb.mxu2 %v1048_v19  ;;  %315 = vst [vmem:[#allocation1 + $0x1] ss:$4 sm:$0xff] %v1307_v59 }
  0x2e   : > { %617 = vmatpush.msrb.mxu0 %v1004_v14  ;;  %739 = vmatpush.msrb.mxu1 %v1029_v17  ;;  %317 = vst [vmem:[#allocation1 + $0x2] ss:$4 sm:$0xff] %v1310_v60 }
  0x2f   : > { %1055 = vmatpush.msrb.mxu3 %v1004_v14  ;;  %818 = vmatpush.msrb.mxu2 %v1047_v22  ;;  %319 = vst [vmem:[#allocation1 + $0x3] ss:$4 sm:$0xff] %v1313_v61  ;;  %v284_v33 = vld.sshfl [vmem:[#allocation1 + $0x20] sm:$0xff pattern:$0x73625140] }
  0x30   : > { %618 = vmatpush.msrb.mxu0 %v1003_v18  ;;  %740 = vmatpush.msrb.mxu1 %v1028_v20  ;;  %321 = vst [vmem:[#allocation1 + $0x20] ss:$4 sm:$0xff] %v1335_v7 }
  0x31   : > { %1056 = vmatpush.msrb.mxu3 %v1003_v18  ;;  %819 = vmatpush.msrb.mxu2 %v1046_v25  ;;  %323 = vst [vmem:[#allocation1 + $0x21] ss:$4 sm:$0xff] %v1323_v1  ;;  %v1024_v25 = vld [vmem:[%s1586_s1 + $0x290] sm:$0xff] }
  0x32   : > { %619 = vmatpush.msrb.mxu0 %v1002_v21  ;;  %741 = vmatpush.msrb.mxu1 %v1027_v23  ;;  %325 = vst [vmem:[#allocation1 + $0x22] ss:$4 sm:$0xff] %v1341_v9 }
  0x33   : > { %1057 = vmatpush.msrb.mxu3 %v1002_v21  ;;  %820 = vmatpush.msrb.mxu2 %v1045_v29  ;;  %327 = vst [vmem:[#allocation1 + $0x23] ss:$4 sm:$0xff] %v1332_v6  ;;  %v1042_v29 = vld [vmem:[%s1586_s1 + $0x310] sm:$0xff] }
  0x34   : > { %620 = vmatpush.msrb.mxu0 %v1001_v24  ;;  %742 = vmatpush.msrb.mxu1 %v1026_v26  ;;  %v1043_v26 = vld [vmem:[%s1586_s1 + $0x318] sm:$0xff] }
  0x35   : > { %1058 = vmatpush.msrb.mxu3 %v1001_v24  ;;  %946 = vmatmul.msk.f32.vlgmr.msra.gmra.mxu0 %vm285_vm0, %v283_v27  ;;  %v998_v24 = vld [vmem:[%s1586_s1 + $0x210] sm:$0xff]  ;;  %v997_v27 = vld [vmem:[%s1586_s1 + $0x208] sm:$0xff] }
  0x36   : > { %621 = vmatpush.msrb.mxu0 %v1000_v28  ;;  %743 = vmatpush.msrb.mxu1 %v1025_v31  ;;  %v328_v34 = vld.sshfl [vmem:[#allocation1] sm:$0xff pattern:$0x73625140] }
  0x37   : > { %1059 = vmatpush.msrb.mxu3 %v1000_v28  ;;  %821 = vmatpush.msrb.mxu2 %v1044_v32  ;;  %357 = vst.sshfl [vmem:[#allocation1] sm:$0xff pattern:$0x73625140] %v1304_v58  ;;  %v1023_v28 = vld [vmem:[%s1586_s1 + $0x288] sm:$0xff] }
  0x38   : > { %622 = vmatpush.msrb.mxu0 %v999_v30  ;;  %948 = vmatmul.msk.f32.vlgmr.msra.gmra.mxu1 %vm285_vm0, %v328_v34 }
  0x39   : > { %1060 = vmatpush.msrb.mxu3 %v999_v30  ;;  %744 = vmatpush.msrb.mxu1 %v1024_v25 }
  0x3a   : > { %v329_v35 = vld.sshfl [vmem:[#allocation1 + $0x20] sm:$0xff pattern:$0x73625140]  ;;  %623 = vmatpush.msrb.mxu0 %v998_v24  ;;  %822 = vmatpush.msrb.mxu2 %v1043_v26 }
  0x3b   : > { %360 = vst.sshfl [vmem:[#allocation1 + $0x20] sm:$0xff pattern:$0x73625140] %v1307_v59  ;;  %1061 = vmatpush.msrb.mxu3 %v998_v24  ;;  %745 = vmatpush.msrb.mxu1 %v1023_v28 }
  0x3c   : > { %624 = vmatpush.msrb.mxu0 %v997_v27  ;;  %823 = vmatpush.msrb.mxu2 %v1042_v29 }
  0x3d   : > { %947 = vmatmul.msk.f32.gmra.mxu0 %vm285_vm0, %v284_v33  ;;  %v996_v33 = vld [vmem:[%s1586_s1 + $0x200] sm:$0xff]  ;;  %1062 = vmatpush.msrb.mxu3 %v997_v27 }
  0x3e   : > { %v359_v36 = vld [vmem:[#allocation1 + $0x1] ss:$4 sm:$0xff]  ;;  %625 = vmatpush.msrb.mxu0 %v996_v33 }
  0x3f   : > { %363 = vst.sshfl [vmem:[#allocation1] sm:$0xff pattern:$0x73625140] %v1310_v60  ;;  %1063 = vmatpush.msrb.mxu3 %v996_v33 }
  0x40   : > { %949 = vmatmul.msk.f32.gmra.mxu1 %vm285_vm0, %v329_v35  ;;  %v1022_v35 = vld [vmem:[%s1586_s1 + $0x280] sm:$0xff] }
  0x41   : > { %746 = vmatpush.msrb.mxu1 %v1022_v35 }
  0x42   : > { %v362_v37 = vld [vmem:[#allocation1 + $0x21] ss:$4 sm:$0xff] }
  0x43   : > { %365 = vst.sshfl [vmem:[#allocation1 + $0x20] sm:$0xff pattern:$0x73625140] %v1313_v61 }
  0x46   : > { %v364_v38 = vld [vmem:[#allocation1 + $0x1] ss:$4 sm:$0xff] }
  0x47   : > { %367 = vst.sshfl [vmem:[#allocation1] sm:$0xff pattern:$0x73625140] %v1335_v7 }
  0x4a   : > { %v366_v39 = vld [vmem:[#allocation1 + $0x21] ss:$4 sm:$0xff] }
  0x4b   : > { %369 = vst.sshfl [vmem:[#allocation1 + $0x20] sm:$0xff pattern:$0x73625140] %v1323_v1 }
  0x4e   : > { %v368_v40 = vld [vmem:[#allocation1 + $0x1] ss:$4 sm:$0xff] }
  0x4f   : > { %371 = vst.sshfl [vmem:[#allocation1] sm:$0xff pattern:$0x73625140] %v1341_v9 }
  0x50   : > { %391 = vst [vmem:[#allocation1] ss:$4 sm:$0xff] %v359_v36  ;;  %v1041_v36 = vld [vmem:[%s1586_s1 + $0x308] sm:$0xff] }
  0x51   : > { %395 = vst [vmem:[#allocation1 + $0x2] ss:$4 sm:$0xff] %v364_v38  ;;  %824 = vmatpush.msrb.mxu2 %v1041_v36 }
  0x52   : > { %v370_v41 = vld [vmem:[#allocation1 + $0x21] ss:$4 sm:$0xff]  ;;  %397 = vst [vmem:[#allocation1 + $0x3] ss:$4 sm:$0xff] %v366_v39 }
  0x53   : > { %373 = vst.sshfl [vmem:[#allocation1 + $0x20] sm:$0xff pattern:$0x73625140] %v1332_v6  ;;  %v995_v39 = vld [vmem:[%s1586_s1 + $0x1f8] sm:$0xff] }
  0x54   : > { %399 = vst [vmem:[#allocation1 + $0x20] ss:$4 sm:$0xff] %v368_v40  ;;  %v1021_v40 = vld [vmem:[%s1586_s1 + $0x278] sm:$0xff]  ;;  %626 = vmatpush.msrb.mxu0 %v995_v39  ;;  %1064 = vmatpush.msrb.mxu3 %v995_v39 }
  0x55   : > { %747 = vmatpush.msrb.mxu1 %v1021_v40 }
  0x56   : > { %v372_v42 = vld [vmem:[#allocation1 + $0x1] ss:$4 sm:$0xff] }
  0x57   : > { %393 = vst [vmem:[#allocation1 + $0x1] ss:$4 sm:$0xff] %v362_v37 }
  0x58   : > { %403 = vst [vmem:[#allocation1 + $0x22] ss:$4 sm:$0xff] %v372_v42 }
  0x5a   : > { %v374_v43 = vld [vmem:[#allocation1 + $0x21] ss:$4 sm:$0xff] }
  0x5b   : > { %401 = vst [vmem:[#allocation1 + $0x21] ss:$4 sm:$0xff] %v370_v41  ;;  %v1040_v41 = vld [vmem:[%s1586_s1 + $0x300] sm:$0xff] }
  0x5c   : > { %405 = vst [vmem:[#allocation1 + $0x23] ss:$4 sm:$0xff] %v374_v43  ;;  %825 = vmatpush.msrb.mxu2 %v1040_v41 }
  0x5e   : > { %v406_v44 = vld.sshfl [vmem:[#allocation1] sm:$0xff pattern:$0x73625140] }
  0x5f   : > { %437 = vst.sshfl [vmem:[#allocation1] sm:$0xff pattern:$0x73625140] %v1304_v58  ;;  %965 = vmatmul.msk.f32.vlgmr.msra.gmra.mxu2 %vm285_vm0, %v406_v44 }
  0x63   : > { %v407_v45 = vld.sshfl [vmem:[#allocation1 + $0x20] sm:$0xff pattern:$0x73625140] }
  0x64   : > { %442 = vst.sshfl [vmem:[#allocation1 + $0x20] sm:$0xff pattern:$0x73625140] %v1307_v59 }
  0x66   : > { %v439_v46 = vld [vmem:[#allocation1 + $0x1] ss:$4 sm:$0xff]  ;;  %v441_v47 = vld [vmem:[#allocation1 + $0x2] ss:$4 sm:$0xff] }
  0x67   : > { %447 = vst.sshfl [vmem:[#allocation1] sm:$0xff pattern:$0x73625140] %v1310_v60  ;;  %966 = vmatmul.msk.f32.gmra.mxu2 %vm285_vm0, %v407_v45  ;;  %v967_v52 = vrot.slane %v439_v46, 9  ;;  %v467_v53 = vrot.slane %v441_v47, 7  ;;  %v994_v46 = vld [vmem:[%s1586_s1 + $0x1f0] sm:$0xff] }
  0x68   : > { %627 = vmatpush.msrb.mxu0 %v994_v46  ;;  %v1020_v47 = vld [vmem:[%s1586_s1 + $0x270] sm:$0xff]  ;;  %1065 = vmatpush.msrb.mxu3 %v994_v46 }
  0x69   : > { %v468_v63 = vsel %vm1428_vm7, %v967_v52, %v467_v53  ;;  %748 = vmatpush.msrb.mxu1 %v1020_v47  ;;  %v992_v52 = vld [vmem:[%s1586_s1 + $0x1e0] sm:$0xff] }
  0x6a   : > { %v1018_v53 = vld [vmem:[%s1586_s1 + $0x260] sm:$0xff] }
  0x6b   : > { %v444_v48 = vld [vmem:[#allocation1 + $0x21] ss:$4 sm:$0xff]  ;;  %v446_v49 = vld [vmem:[#allocation1 + $0x22] ss:$4 sm:$0xff] }
  0x6c   : > { %450 = vst.sshfl [vmem:[#allocation1 + $0x20] sm:$0xff pattern:$0x73625140] %v1313_v61  ;;  %v968_v8 = vrot.slane %v444_v48, 9  ;;  %v471_v10 = vrot.slane %v446_v49, 7  ;;  %v1039_v48 = vld [vmem:[%s1586_s1 + $0x2f8] sm:$0xff] }
  0x6d   : > { %v993_v49 = vld [vmem:[%s1586_s1 + $0x1e8] sm:$0xff]  ;;  %826 = vmatpush.msrb.mxu2 %v1039_v48 }
  0x6e   : > { %v448_v50 = vld [vmem:[#allocation1 + $0x1] ss:$4 sm:$0xff]  ;;  %v449_v51 = vld [vmem:[#allocation1 + $0x2] ss:$4 sm:$0xff]  ;;  %v472_v16 = vsel %vm1428_vm7, %v968_v8, %v471_v10  ;;  %628 = vmatpush.msrb.mxu0 %v993_v49  ;;  %1066 = vmatpush.msrb.mxu3 %v993_v49 }
  0x6f   : > { %453 = vst.sshfl [vmem:[#allocation1] sm:$0xff pattern:$0x73625140] %v1335_v7  ;;  %v969_v11 = vrot.slane %v448_v50, 9  ;;  %v475_v12 = vrot.slane %v449_v51, 7  ;;  %v1019_v50 = vld [vmem:[%s1586_s1 + $0x268] sm:$0xff] }
  0x70   : > { %v1038_v51 = vld [vmem:[%s1586_s1 + $0x2f0] sm:$0xff]  ;;  %749 = vmatpush.msrb.mxu1 %v1019_v50  ;;  %629 = vmatpush.msrb.mxu0 %v992_v52  ;;  %v1036_v8 = vld [vmem:[%s1586_s1 + $0x2e0] sm:$0xff] }
  0x71   : > { %v476_v17 = vsel %vm1428_vm7, %v969_v11, %v475_v12  ;;  %827 = vmatpush.msrb.mxu2 %v1038_v51  ;;  %1067 = vmatpush.msrb.mxu3 %v992_v52 }
  0x72   : > { %750 = vmatpush.msrb.mxu1 %v1018_v53 }
  0x73   : > { %v451_v55 = vld [vmem:[#allocation1 + $0x21] ss:$4 sm:$0xff]  ;;  %v452_v56 = vld [vmem:[#allocation1 + $0x22] ss:$4 sm:$0xff] }
  0x74   : > { %456 = vst.sshfl [vmem:[#allocation1 + $0x20] sm:$0xff pattern:$0x73625140] %v1323_v1  ;;  %v970_v57 = vrot.slane %v451_v55, 9  ;;  %v479_v62 = vrot.slane %v452_v56, 7  ;;  %v1037_v55 = vld [vmem:[%s1586_s1 + $0x2e8] sm:$0xff] }
  0x75   : > { %828 = vmatpush.msrb.mxu2 %v1037_v55 }
  0x76   : > { %v454_v0 = vld [vmem:[#allocation1 + $0x1] ss:$4 sm:$0xff]  ;;  %v455_v2 = vld [vmem:[#allocation1 + $0x2] ss:$4 sm:$0xff]  ;;  %v480_v3 = vsel %vm1428_vm7, %v970_v57, %v479_v62 }
  0x77   : > { %459 = vst.sshfl [vmem:[#allocation1] sm:$0xff pattern:$0x73625140] %v1341_v9  ;;  %v971_v4 = vrot.slane %v454_v0, 9  ;;  %v483_v5 = vrot.slane %v455_v2, 7  ;;  %829 = vmatpush.msrb.mxu2 %v1036_v8 }
  0x78   : > { %513 = vst [vmem:[#allocation1] ss:$4 sm:$0xff] %v468_v63 }
  0x79   : > { %519 = vst [vmem:[#allocation1 + $0x3] ss:$4 sm:$0xff] %v480_v3  ;;  %v484_v13 = vsel %vm1428_vm7, %v971_v4, %v483_v5  ;;  %v1017_v5 = vld [vmem:[%s1586_s1 + $0x258] sm:$0xff] }
  0x7a   : > { %751 = vmatpush.msrb.mxu1 %v1017_v5 }
  0x7b   : > { %v457_v14 = vld [vmem:[#allocation1 + $0x21] ss:$4 sm:$0xff]  ;;  %v458_v15 = vld [vmem:[#allocation1 + $0x22] ss:$4 sm:$0xff] }
  0x7c   : > { %462 = vst.sshfl [vmem:[#allocation1 + $0x20] sm:$0xff pattern:$0x73625140] %v1332_v6  ;;  %v972_v20 = vrot.slane %v457_v14, 9  ;;  %v487_v21 = vrot.slane %v458_v15, 7 }
  0x7d   : > { %521 = vst [vmem:[#allocation1 + $0x20] ss:$4 sm:$0xff] %v484_v13 }
  0x7e   : > { %v460_v18 = vld [vmem:[#allocation1 + $0x1] ss:$4 sm:$0xff]  ;;  %v461_v19 = vld [vmem:[#allocation1 + $0x2] ss:$4 sm:$0xff]  ;;  %v488_v30 = vsel %vm1428_vm7, %v972_v20, %v487_v21 }
  0x7f   : > { %515 = vst [vmem:[#allocation1 + $0x1] ss:$4 sm:$0xff] %v472_v16  ;;  %v973_v22 = vrot.slane %v460_v18, 9  ;;  %v491_v23 = vrot.slane %v461_v19, 7  ;;  %v1034_v18 = vld [vmem:[%s1586_s1 + $0x2d0] sm:$0xff] }
  0x80   : > { %517 = vst [vmem:[#allocation1 + $0x2] ss:$4 sm:$0xff] %v476_v17  ;;  %v1035_v17 = vld [vmem:[%s1586_s1 + $0x2d8] sm:$0xff] }
  0x81   : > { %v492_v34 = vsel %vm1428_vm7, %v973_v22, %v491_v23  ;;  %830 = vmatpush.msrb.mxu2 %v1035_v17 }
  0x83   : > { %v463_v31 = vld [vmem:[#allocation1 + $0x21] ss:$4 sm:$0xff]  ;;  %v464_v32 = vld [vmem:[#allocation1 + $0x22] ss:$4 sm:$0xff]  ;;  %831 = vmatpush.msrb.mxu2 %v1034_v18 }
  0x84   : > { %v974_v37 = vrot.slane %v463_v31, 9  ;;  %v495_v38 = vrot.slane %v464_v32, 7  ;;  %523 = vst [vmem:[#allocation1 + $0x21] ss:$4 sm:$0xff] %v488_v30 }
  0x85   : > { %525 = vst [vmem:[#allocation1 + $0x22] ss:$4 sm:$0xff] %v492_v34 }
  0x86   : > { %v496_v42 = vsel %vm1428_vm7, %v974_v37, %v495_v38 }
  0x87   : > { %v528_v43 = vld.sshfl [vmem:[#allocation1] sm:$0xff pattern:$0x73625140]  ;;  %527 = vst [vmem:[#allocation1 + $0x23] ss:$4 sm:$0xff] %v496_v42 }
  0x88   : > { %990 = vmatmul.msk.f32.vlgmr.msra.gmra.mxu3 %vm285_vm0, %v528_v43  ;;  %559 = vst.sshfl [vmem:[#allocation1] sm:$0xff pattern:$0x73625140] %v1304_v58 }
  0x8e   : > { %v529_v44 = vld.sshfl [vmem:[#allocation1 + $0x20] sm:$0xff pattern:$0x73625140] }
  0x8f   : > { %v561_v45 = vld [vmem:[#allocation1 + $0x2] ss:$4 sm:$0xff]  ;;  %562 = vst.sshfl [vmem:[#allocation1 + $0x20] sm:$0xff pattern:$0x73625140] %v1307_v59 }
  0x90   : > { %565 = vst.sshfl [vmem:[#allocation1] sm:$0xff pattern:$0x73625140] %v1310_v60  ;;  %991 = vmatmul.msk.f32.gmra.mxu3 %vm285_vm0, %v529_v44 }
  0x96   : > { %v564_v56 = vld [vmem:[#allocation1 + $0x22] ss:$4 sm:$0xff] }
  0x97   : > { %v566_v57 = vld [vmem:[#allocation1 + $0x2] ss:$4 sm:$0xff]  ;;  %567 = vst.sshfl [vmem:[#allocation1 + $0x20] sm:$0xff pattern:$0x73625140] %v1313_v61 }
  0x98   : > { %569 = vst.sshfl [vmem:[#allocation1] sm:$0xff pattern:$0x73625140] %v1335_v7 }
  0x9e   : > { %v568_v62 = vld [vmem:[#allocation1 + $0x22] ss:$4 sm:$0xff] }
  0x9f   : > { %v570_v63 = vld [vmem:[#allocation1 + $0x2] ss:$4 sm:$0xff]  ;;  %571 = vst.sshfl [vmem:[#allocation1 + $0x20] sm:$0xff pattern:$0x73625140] %v1323_v1 }
  0xa0   : > { %573 = vst.sshfl [vmem:[#allocation1] sm:$0xff pattern:$0x73625140] %v1341_v9 }
  0xa1   : > { %593 = vst [vmem:[#allocation1] ss:$4 sm:$0xff] %v561_v45 }
  0xa2   : > { %595 = vst [vmem:[#allocation1 + $0x1] ss:$4 sm:$0xff] %v564_v56 }
  0xa3   : > { %599 = vst [vmem:[#allocation1 + $0x3] ss:$4 sm:$0xff] %v568_v62 }
  0xa6   : > { %v572_v0 = vld [vmem:[#allocation1 + $0x22] ss:$4 sm:$0xff] }
  0xa7   : > { %575 = vst.sshfl [vmem:[#allocation1 + $0x20] sm:$0xff pattern:$0x73625140] %v1332_v6  ;;  %v574_v2 = vld [vmem:[#allocation1 + $0x2] ss:$4 sm:$0xff] }
  0xa8   : > { %601 = vst [vmem:[#allocation1 + $0x20] ss:$4 sm:$0xff] %v570_v63 }
  0xa9   : > { %603 = vst [vmem:[#allocation1 + $0x21] ss:$4 sm:$0xff] %v572_v0 }
  0xaa   : > { %597 = vst [vmem:[#allocation1 + $0x2] ss:$4 sm:$0xff] %v566_v57 }
  0xae   : > { %v576_v3 = vld [vmem:[#allocation1 + $0x22] ss:$4 sm:$0xff] }
  0xaf   : > { %607 = vst [vmem:[#allocation1 + $0x23] ss:$4 sm:$0xff] %v576_v3 }
  0xb0   : > { %605 = vst [vmem:[#allocation1 + $0x22] ss:$4 sm:$0xff] %v574_v2 }
  0xb1   : > { %v608_v4 = vld.sshfl [vmem:[#allocation1] sm:$0xff pattern:$0x73625140] }
  0xb2   : > { %1007 = vmatmul.msk.f32.vlgmr.msrb.gmra.mxu0 %vm285_vm0, %v608_v4  ;;  %639 = vst.sshfl [vmem:[#allocation1] sm:$0xff pattern:$0x73625140] %v1304_v58 }
  0xb7   : > { %v609_v10 = vld.sshfl [vmem:[#allocation1 + $0x20] sm:$0xff pattern:$0x73625140] }
  0xb8   : > { %1008 = vmatmul.msk.f32.vlgmr.msrb.gmra.mxu3 %vm285_vm0, %v609_v10  ;;  %644 = vst.sshfl [vmem:[#allocation1 + $0x20] sm:$0xff pattern:$0x73625140] %v1307_v59 }
  0xb9   : > { %v641_v11 = vld [vmem:[#allocation1 + $0x2] ss:$4 sm:$0xff]  ;;  %v643_v12 = vld [vmem:[#allocation1 + $0x3] ss:$4 sm:$0xff] }
  0xba   : > { %649 = vst.sshfl [vmem:[#allocation1] sm:$0xff pattern:$0x73625140] %v1310_v60  ;;  %v1009_v19 = vrot.slane %v641_v11, 9  ;;  %v669_v20 = vrot.slane %v643_v12, 7 }
  0xbc   : > { %v670_v25 = vsel %vm1428_vm7, %v1009_v19, %v669_v20  ;;  %v1076_v19 = vld [vmem:[%s1587_s2] ss:$0 sm:$0xff] }
  0xbf   : > { %v646_v13 = vld [vmem:[#allocation1 + $0x22] ss:$4 sm:$0xff]  ;;  %v648_v14 = vld [vmem:[#allocation1 + $0x23] ss:$4 sm:$0xff] }
  0xc0   : > { %652 = vst.sshfl [vmem:[#allocation1 + $0x20] sm:$0xff pattern:$0x73625140] %v1313_v61  ;;  %v1010_v21 = vrot.slane %v646_v13, 9  ;;  %v673_v22 = vrot.slane %v648_v14, 7 }
  0xc1   : > { %v650_v15 = vld [vmem:[#allocation1 + $0x2] ss:$4 sm:$0xff]  ;;  %v651_v16 = vld [vmem:[#allocation1 + $0x3] ss:$4 sm:$0xff] }
  0xc2   : > { %655 = vst.sshfl [vmem:[#allocation1] sm:$0xff pattern:$0x73625140] %v1335_v7  ;;  %v674_v28 = vsel %vm1428_vm7, %v1010_v21, %v673_v22  ;;  %v1011_v31 = vrot.slane %v650_v15, 9  ;;  %v677_v32 = vrot.slane %v651_v16, 7 }
  0xc4   : > { %v678_v38 = vsel %vm1428_vm7, %v1011_v31, %v677_v32 }
  0xc7   : > { %v653_v23 = vld [vmem:[#allocation1 + $0x22] ss:$4 sm:$0xff]  ;;  %v654_v24 = vld [vmem:[#allocation1 + $0x23] ss:$4 sm:$0xff] }
  0xc8   : > { %658 = vst.sshfl [vmem:[#allocation1 + $0x20] sm:$0xff pattern:$0x73625140] %v1323_v1  ;;  %v1012_v33 = vrot.slane %v653_v23, 9  ;;  %v681_v34 = vrot.slane %v654_v24, 7 }
  0xc9   : > { %v656_v26 = vld [vmem:[#allocation1 + $0x2] ss:$4 sm:$0xff]  ;;  %v657_v27 = vld [vmem:[#allocation1 + $0x3] ss:$4 sm:$0xff] }
  0xca   : > { %661 = vst.sshfl [vmem:[#allocation1] sm:$0xff pattern:$0x73625140] %v1341_v9  ;;  %v1013_v29 = vrot.slane %v656_v26, 9  ;;  %v685_v30 = vrot.slane %v657_v27, 7  ;;  %v682_v43 = vsel %vm1428_vm7, %v1012_v33, %v681_v34 }
  0xcb   : > { %715 = vst [vmem:[#allocation1] ss:$4 sm:$0xff] %v670_v25 }
  0xcc   : > { %717 = vst [vmem:[#allocation1 + $0x1] ss:$4 sm:$0xff] %v674_v28  ;;  %v686_v35 = vsel %vm1428_vm7, %v1013_v29, %v685_v30 }
  0xcf   : > { %v659_v36 = vld [vmem:[#allocation1 + $0x22] ss:$4 sm:$0xff]  ;;  %v660_v37 = vld [vmem:[#allocation1 + $0x23] ss:$4 sm:$0xff] }
  0xd0   : > { %664 = vst.sshfl [vmem:[#allocation1 + $0x20] sm:$0xff pattern:$0x73625140] %v1332_v6  ;;  %v1014_v39 = vrot.slane %v659_v36, 9  ;;  %v689_v40 = vrot.slane %v660_v37, 7 }
  0xd1   : > { %v662_v41 = vld [vmem:[#allocation1 + $0x2] ss:$4 sm:$0xff]  ;;  %v663_v42 = vld [vmem:[#allocation1 + $0x3] ss:$4 sm:$0xff]  ;;  %723 = vst [vmem:[#allocation1 + $0x20] ss:$4 sm:$0xff] %v686_v35 }
  0xd2   : > { %v690_v44 = vsel %vm1428_vm7, %v1014_v39, %v689_v40  ;;  %v1015_v45 = vrot.slane %v662_v41, 9  ;;  %v693_v46 = vrot.slane %v663_v42, 7  ;;  %719 = vst [vmem:[#allocation1 + $0x2] ss:$4 sm:$0xff] %v678_v38 }
  0xd3   : > { %725 = vst [vmem:[#allocation1 + $0x21] ss:$4 sm:$0xff] %v690_v44 }
  0xd4   : > { %721 = vst [vmem:[#allocation1 + $0x3] ss:$4 sm:$0xff] %v682_v43  ;;  %v694_v47 = vsel %vm1428_vm7, %v1015_v45, %v693_v46 }
  0xd7   : > { %v665_v48 = vld [vmem:[#allocation1 + $0x22] ss:$4 sm:$0xff]  ;;  %v666_v49 = vld [vmem:[#allocation1 + $0x23] ss:$4 sm:$0xff] }
  0xd8   : > { %v1016_v50 = vrot.slane %v665_v48, 9  ;;  %v697_v51 = vrot.slane %v666_v49, 7  ;;  %727 = vst [vmem:[#allocation1 + $0x22] ss:$4 sm:$0xff] %v694_v47 }
  0xda   : > { %v698_v52 = vsel %vm1428_vm7, %v1016_v50, %v697_v51 }
  0xdb   : > { %729 = vst [vmem:[#allocation1 + $0x23] ss:$4 sm:$0xff] %v698_v52  ;;  %v730_v53 = vld.sshfl [vmem:[#allocation1] sm:$0xff pattern:$0x73625140] }
  0xdc   : > { %1032 = vmatmul.msk.f32.vlgmr.msrb.gmra.mxu1 %vm285_vm0, %v730_v53  ;;  %761 = vst.sshfl [vmem:[#allocation1] sm:$0xff pattern:$0x73625140] %v1304_v58 }
  0xe2   : > { %v731_v55 = vld.sshfl [vmem:[#allocation1 + $0x20] sm:$0xff pattern:$0x73625140]  ;;  %v429_v2 = vpop.f32.mrf.mxu2 }
  0xe3   : > { %764 = vst.sshfl [vmem:[#allocation1 + $0x20] sm:$0xff pattern:$0x73625140] %v1307_v59  ;;  %v763_v56 = vld [vmem:[#allocation1 + $0x3] ss:$4 sm:$0xff] }
  0xe4   : > { %767 = vst.sshfl [vmem:[#allocation1] sm:$0xff pattern:$0x73625140] %v1310_v60  ;;  %1033 = vmatmul.msk.f32.gmra.mxu1 %vm285_vm0, %v731_v55 }
  0xea   : > { %v766_v57 = vld [vmem:[#allocation1 + $0x23] ss:$4 sm:$0xff]  ;;  %v432_v10 = vpop.f32.mrf.mxu2 }
  0xeb   : > { %v768_v62 = vld [vmem:[#allocation1 + $0x3] ss:$4 sm:$0xff]  ;;  %769 = vst.sshfl [vmem:[#allocation1 + $0x20] sm:$0xff pattern:$0x73625140] %v1313_v61 }
  0xec   : > { %771 = vst.sshfl [vmem:[#allocation1] sm:$0xff pattern:$0x73625140] %v1335_v7  ;;  %v307_v7 = vpop.f32.mrf.mxu0 }
  0xf2   : > { %v770_v54 = vld [vmem:[#allocation1 + $0x23] ss:$4 sm:$0xff] }
  0xf3   : > { %v772_v63 = vld [vmem:[#allocation1 + $0x3] ss:$4 sm:$0xff]  ;;  %773 = vst.sshfl [vmem:[#allocation1 + $0x20] sm:$0xff pattern:$0x73625140] %v1323_v1 }
  0xf4   : > { %775 = vst.sshfl [vmem:[#allocation1] sm:$0xff pattern:$0x73625140] %v1341_v9  ;;  %v351_v9 = vpop.f32.mrf.mxu1  ;;  %v310_v3 = vpop.f32.mrf.mxu0 }
  0xf5   : > { %795 = vst [vmem:[#allocation1] ss:$4 sm:$0xff] %v763_v56  ;;  %v352_v4 = vadd.f32 %v351_v9, %v307_v7 }
  0xf6   : > { %797 = vst [vmem:[#allocation1 + $0x1] ss:$4 sm:$0xff] %v766_v57 }
  0xf7   : > { %799 = vst [vmem:[#allocation1 + $0x2] ss:$4 sm:$0xff] %v768_v62  ;;  %v435_v5 = vadd.f32 %v429_v2, %v352_v4 }
  0xfa   : > { %v774_v58 = vld [vmem:[#allocation1 + $0x23] ss:$4 sm:$0xff] }
  0xfb   : > { %v776_v59 = vld [vmem:[#allocation1 + $0x3] ss:$4 sm:$0xff]  ;;  %777 = vst.sshfl [vmem:[#allocation1 + $0x20] sm:$0xff pattern:$0x73625140] %v1332_v6 }
  0xfc   : > { %801 = vst [vmem:[#allocation1 + $0x3] ss:$4 sm:$0xff] %v770_v54  ;;  %v354_v6 = vpop.f32.mrf.mxu1 }
  0xfd   : > { %803 = vst [vmem:[#allocation1 + $0x20] ss:$4 sm:$0xff] %v772_v63  ;;  %v355_v11 = vadd.f32 %v354_v6, %v310_v3 }
  0xfe   : > { %805 = vst [vmem:[#allocation1 + $0x21] ss:$4 sm:$0xff] %v774_v58 }
  0xff   : > { %807 = vst [vmem:[#allocation1 + $0x22] ss:$4 sm:$0xff] %v776_v59  ;;  %v436_v16 = vadd.f32 %v432_v10, %v355_v11 }
 0x102   : > { %v778_v60 = vld [vmem:[#allocation1 + $0x23] ss:$4 sm:$0xff] }
 0x103   : > { %v810_v61 = vld.sshfl [vmem:[#allocation1] sm:$0xff pattern:$0x73625140]  ;;  %809 = vst [vmem:[#allocation1 + $0x23] ss:$4 sm:$0xff] %v778_v60 }
 0x104   : > { %1049 = vmatmul.msk.f32.vlgmr.msrb.gmra.mxu2 %vm285_vm0, %v810_v61 }
 0x10a   : > { %v811_v1 = vld.sshfl [vmem:[#allocation1 + $0x20] sm:$0xff pattern:$0x73625140] }
 0x10b   : > { %v551_v0 = vpop.f32.mrf.mxu3 }
 0x10c   : > { %1050 = vmatmul.msk.f32.gmra.mxu2 %vm285_vm0, %v811_v1  ;;  %v557_v12 = vadd.f32 %v551_v0, %v435_v5 }
 0x113   : > { %v554_v8 = vpop.f32.mrf.mxu3 }
 0x114   : > { %v558_v18 = vadd.f32 %v554_v8, %v436_v16 }
 0x12f   : > { %v631_v13 = vpop.f32.mrf.mxu0 }
 0x130   : > { %v637_v15 = vadd.f32 %v631_v13, %v557_v12 }
 0x13b   : > { %v634_v20 = vpop.f32.mrf.mxu3 }
 0x13c   : > { %v638_v23 = vadd.f32 %v634_v20, %v558_v18 }
 0x159   : > { %v753_v14 = vpop.f32.mrf.mxu1 }
 0x15a   : > { %v759_v17 = vadd.f32 %v753_v14, %v637_v15 }
 0x161   : > { %v756_v25 = vpop.f32.mrf.mxu1 }
 0x162   : > { %v760_v26 = vadd.f32 %v756_v25, %v638_v23 }
 0x187   : > { %v833_v21 = vpop.f32.mrf.mxu2 }
 0x188   : > { %v839_v22 = vadd.f32 %v833_v21, %v759_v17 }
 0x18a   : > { %v845_v24 = vadd.f32 %v1076_v19, %v839_v22 }
 0x18c   : > { %848 = vst.msk [vmem:[%s172_s9] sm:$0xff] %vm847_vm8, %v845_v24 }
 0x18f   : > { %v836_v27 = vpop.f32.mrf.mxu2 }
 0x190   : > { %v840_v28 = vadd.f32 %v836_v27, %v760_v26 }
 0x192   : > { %v846_v29 = vadd.f32 %v1076_v19, %v840_v28 }
 0x194   : > { %849 = vst.msk [vmem:[%s172_s9 + $0x8] sm:$0xff] %vm847_vm8, %v846_v29 }
 0x195 PF: > { %s13_s12 = sadd.s32 1, %s1083_s12  }
 0x196   : > { %p10_p5 = scmp.ge.s32.totalorder %s13_s12, 4  }
 0x198   :  { %12 = sbr.rel (!%p10_p5) target bundleno = 1 (0x1), region = 131 }

</bundles_post_ra>
